<compile_context>
chip_gen: v7x
topology: tpu7x:2x2x1
jax: 0.10.0
libtpu: 0.0.40
codegen_flags: <defaults>
</compile_context>

<pallas_src>
import functools

import jax
import jax.numpy as jnp
from jax.experimental import pallas as pl
from jax.experimental.pallas import tpu as pltpu

EPSILON = 1e-10       # matches EPISILON in the PyTorch module
NORM_EPS = 1e-12      # F.normalize default eps
TEMPERATURE = 1.0     # module __init__ default

_LANE = 128
_NEG_INF = -1e30
# Keep (intermediates + double-buffered inputs) under v7x's 64 MiB physical
# VMEM; default scoped limits are lower on all generations, so raise it here.
_VMEM_LIMIT_BYTES = 48 * 1024 * 1024


def _round_up(x, m):
    return ((x + m - 1) // m) * m


def _choose_tile_m(n_pad, d_pad):
    """Largest row tile in {512, 256, 128} that divides n_pad and fits VMEM."""
    for tile in (512, 256, 128):
        if n_pad % tile:
            continue
        resident = n_pad * d_pad * (2 * 4 + 2)   # f2 input (dbl-buffered f32) + bf16 scratch
        per_tile = tile * d_pad * 4 * 2          # f1 row tile, double-buffered
        temps = 6 * tile * n_pad * 4             # live (tile, n_pad) f32 intermediates
        if resident + per_tile + temps <= _VMEM_LIMIT_BYTES:
            return tile
    return 128


def _nce_loss_kernel(f1_ref, f2_ref, tcol_ref, trow_ref, out_ref, f2n_ref, *,
                     n_true, inv_temperature):
    i = pl.program_id(0)
    tile_m = f1_ref.shape[0]
    n_pad = trow_ref.shape[1]

    # ---- step 0 only: zero the accumulator, normalize f2 once, cache as bf16.
    @pl.when(i == 0)
    def _init():
        out_ref[...] = jnp.zeros_like(out_ref)
        f2 = f2_ref[...]
        inv_n2 = jax.lax.rsqrt(
            jnp.maximum(jnp.sum(f2 * f2, axis=1, keepdims=True),
                        NORM_EPS * NORM_EPS))
        f2n_ref[...] = (f2 * inv_n2).astype(f2n_ref.dtype)

    # ---- per-tile: F.normalize(f1, dim=1) via rsqrt * mul (EUP + VPU).
    f1 = f1_ref[...]
    inv_n1 = jax.lax.rsqrt(
        jnp.maximum(jnp.sum(f1 * f1, axis=1, keepdims=True),
                    NORM_EPS * NORM_EPS))
    f1n = (f1 * inv_n1).astype(f2n_ref.dtype)

    # cos[r, c] = f1n[r] . f2n[c]  ( == 1 - 0.5 * ||f1n[r] - f2n[c]||^2 for
    # unit vectors).  bf16 operands, f32 accumulation on the MXU.
    cos = jax.lax.dot_general(
        f1n, f2n_ref[...],
        dimension_numbers=(((1,), (1,)), ((), ())),
        preferred_element_type=jnp.float32)                 # (tile_m, n_pad)

    # Padded columns are removed from the softmax and from both masks.
    col_ids = jax.lax.broadcasted_iota(jnp.int32, (1, n_pad), 1)
    col_valid = col_ids < n_true                            # (1, n_pad) bool

    logits = jnp.where(col_valid, cos * inv_temperature, _NEG_INF)

    # ---- row softmax; positive term kept in log-space (no (tile, N) log).
    m = jnp.max(logits, axis=1, keepdims=True)              # (tile, 1)
    e = jnp.exp(logits - m)                                 # EUP
    sum_e = jnp.sum(e, axis=1, keepdims=True)               # (tile, 1)
    pred = e * pl.reciprocal(sum_e, approx=True)            # softmax probs
    # -log(pred + EPSILON) ~= -log_pred  (EPSILON negligible vs pred here).
    log_pred = (logits - m) - jnp.log(sum_e)                # (tile, n_pad)

    # ---- same-class mask via integer equality; neg_cnt = N - pos_cnt.
    is_pos = jnp.logical_and(tcol_ref[...] == trow_ref[...], col_valid)
    pos_cnt = jnp.sum(is_pos.astype(jnp.float32), axis=1, keepdims=True)
    inv_pos = pl.reciprocal(pos_cnt, approx=True)
    inv_neg = pl.reciprocal(jnp.float32(n_true) - pos_cnt, approx=True)

    pos_term = -log_pred * inv_pos
    neg_term = -jnp.log(1.0 - pred + EPSILON) * inv_neg
    combined = jnp.where(is_pos, pos_term,
                         jnp.where(col_valid, neg_term, 0.0))
    per_row = jnp.sum(combined, axis=1, keepdims=True)      # (tile, 1)

    # Padded rows contribute nothing to the mean.
    row_ids = jax.lax.broadcasted_iota(jnp.int32, (tile_m, 1), 0) + i * tile_m
    per_row = jnp.where(row_ids < n_true, per_row, 0.0)

    out_ref[...] += jnp.sum(per_row, axis=0, keepdims=True)

    @pl.when(i == pl.num_programs(0) - 1)
    def _finalize():
        out_ref[...] = out_ref[...] * jnp.float32(1.0 / n_true)


def nce_loss(f1, f2, targets, *, temperature=TEMPERATURE):
    """Pallas NCELoss forward. f1, f2: [N, D] float; targets: [N] int.

    NOTE: for fleets of tiny independent instances, batch/vmap them into one
    call instead of paying per-call launch overhead for each.
    """
    n, d = f1.shape
    n_pad = _round_up(n, _LANE)
    d_pad = _round_up(d, _LANE)
    tile_m = _choose_tile_m(n_pad, d_pad)

    # Zero-padding D does not change norms or dot products; padded rows /
    # columns are masked inside the kernel.
    f1p = jnp.pad(f1.astype(jnp.float32), ((0, n_pad - n), (0, d_pad - d)))
    f2p = jnp.pad(f2.astype(jnp.float32), ((0, n_pad - n), (0, d_pad - d)))
    tpad = jnp.pad(targets.astype(jnp.int32), (0, n_pad - n),
                   constant_values=-1)
    tcol = tpad.reshape(n_pad, 1)
    trow = tpad.reshape(1, n_pad)

    kernel = functools.partial(_nce_loss_kernel, n_true=n,
                               inv_temperature=1.0 / float(temperature))
    out = pl.pallas_call(
        kernel,
        out_shape=jax.ShapeDtypeStruct((1, 1), jnp.float32),
        grid_spec=pltpu.PrefetchScalarGridSpec(
            num_scalar_prefetch=0,
            grid=(n_pad // tile_m,),
            in_specs=[
                pl.BlockSpec((tile_m, d_pad), lambda i: (i, 0)),   # f1 row tile
                pl.BlockSpec((n_pad, d_pad), lambda i: (0, 0)),    # f2 resident
                pl.BlockSpec((tile_m, 1), lambda i: (i, 0)),       # targets col
                pl.BlockSpec((1, n_pad), lambda i: (0, 0)),        # targets row
            ],
            out_specs=pl.BlockSpec((1, 1), lambda i: (0, 0)),      # shared scalar
            scratch_shapes=[pltpu.VMEM((n_pad, d_pad), jnp.bfloat16)],
        ),
        compiler_params=pltpu.CompilerParams(
            dimension_semantics=("arbitrary",),
            vmem_limit_bytes=_VMEM_LIMIT_BYTES,
        ),
    )(f1p, f2p, tcol, trow)
    return out[0, 0]


def nce_loss_ref(f1, f2, targets):
    """Pure-JAX reference mirroring the PyTorch module exactly."""
    f1n = f1 / jnp.maximum(jnp.linalg.norm(f1, axis=1, keepdims=True), NORM_EPS)
    f2n = f2 / jnp.maximum(jnp.linalg.norm(f2, axis=1, keepdims=True), NORM_EPS)
    mask = targets[:, None] - targets[None, :]
    self_mask = mask != 0
    dist = jnp.sum((f1n[:, None, :] - f2n[None, :, :]) ** 2, axis=2)
    cos = 1.0 - 0.5 * dist
    pred = jax.nn.softmax(cos / TEMPERATURE, axis=1)
    log_pos = -jnp.log(pred + EPSILON) * (~self_mask).astype(jnp.float32)
    log_neg = -jnp.log(1.0 - pred + EPSILON) * self_mask.astype(jnp.float32)
    per_row = (log_pos.sum(1) / (~self_mask).sum(1).astype(jnp.float32)
               + log_neg.sum(1) / self_mask.sum(1).astype(jnp.float32))
    return per_row.mean()


if __name__ == "__main__":
    key = jax.random.PRNGKey(0)
    k1, k2 = jax.random.split(key)
    N, D = 8, 32
    f1 = jax.random.normal(k1, (N, D), dtype=jnp.float32)
    f2 = jax.random.normal(k2, (N, D), dtype=jnp.float32)
    # Every row has at least one positive (itself) and one negative.
    targets = jnp.array([0, 1, 0, 1, 2, 2, 3, 3], dtype=jnp.int32)

    loss = nce_loss(f1, f2, targets)
    jax.block_until_ready(loss)
    ref = nce_loss_ref(f1, f2, targets)
    # bf16 MXU operands + EUP approx reciprocals trade ~1e-3-level absolute
    # error for throughput (per perf review); exact-f32 path agrees to ~1e-6.
    assert jnp.allclose(loss, ref, atol=5e-3, rtol=5e-3), (loss, ref)

    # Second check exercises padding (D=72->128, N=300->384) and the
    # multi-step row-tiled accumulation path.
    k3, k4, k5 = jax.random.split(jax.random.PRNGKey(1), 3)
    N2, D2 = 300, 72
    g1 = jax.random.normal(k3, (N2, D2), dtype=jnp.float32)
    g2 = jax.random.normal(k4, (N2, D2), dtype=jnp.float32)
    t2 = jax.random.randint(k5, (N2,), 0, 10, dtype=jnp.int32)
    loss2 = nce_loss(g1, g2, t2)
    jax.block_until_ready(loss2)
    ref2 = nce_loss_ref(g1, g2, t2)
    assert jnp.allclose(loss2, ref2, atol=5e-3, rtol=5e-3), (loss2, ref2)

    print("KERNEL_OK")
</pallas_src>

<mosaic_0001>
module attributes {stable_mosaic.version = 11 : i64} {
  func.func @_nce_loss_kernel(%arg0: i32, %arg1: memref<128x128xf32, #tpu.memory_space<vmem>>, %arg2: memref<128x128xf32, #tpu.memory_space<vmem>>, %arg3: memref<128x1xi32, #tpu.memory_space<vmem>>, %arg4: memref<1x128xi32, #tpu.memory_space<vmem>>, %arg5: memref<1x1xf32, #tpu.memory_space<vmem>>, %arg6: memref<128x128xbf16, #tpu.memory_space<vmem>>) attributes {dimension_semantics = [#tpu.dimension_semantics<arbitrary>], iteration_bounds = array<i64: 1>, scalar_prefetch = 0 : i64, scratch_operands = 1 : i64, tpu.core_type = #tpu.core_type<tc>, window_params = [{transform_indices = @transform_0, window_bounds = array<i64: 128, 128>}, {pipeline_mode = #tpu.pipeline_mode<synchronous>, transform_indices = @transform_1, window_bounds = array<i64: 128, 128>}, {transform_indices = @transform_2, window_bounds = array<i64: 128, 1>}, {pipeline_mode = #tpu.pipeline_mode<synchronous>, transform_indices = @transform_3, window_bounds = array<i64: 1, 128>}, {pipeline_mode = #tpu.pipeline_mode<synchronous>, transform_indices = @transform_4, window_bounds = array<i64: 1, 1>}]} {
    %c0_i32 = arith.constant 0 : i32
    %0 = arith.cmpi eq, %arg0, %c0_i32 : i32
    %1 = arith.extui %0 : i1 to i32
    %c0_i32_0 = arith.constant 0 : i32
    %2 = arith.cmpi ne, %1, %c0_i32_0 : i32
    scf.if %2 {
      %cst_31 = arith.constant 0.000000e+00 : f32
      %90 = vector.broadcast %cst_31 : f32 to vector<1x1xf32>
      %c0_32 = arith.constant 0 : index
      %c0_33 = arith.constant 0 : index
      %91 = vector.load %arg5[%c0_32, %c0_33] : memref<1x1xf32, #tpu.memory_space<vmem>>, vector<1x1xf32>
      tpu.vector_store %arg5[%c0_32, %c0_33], %90 {strides = array<i32>} : memref<1x1xf32, #tpu.memory_space<vmem>>, vector<1x1xf32>,
      %c0_34 = arith.constant 0 : index
      %c0_35 = arith.constant 0 : index
      %92 = vector.load %arg2[%c0_34, %c0_35] : memref<128x128xf32, #tpu.memory_space<vmem>>, vector<128x128xf32>
      %93 = arith.mulf %92, %92 : vector<128x128xf32>
      %cst_36 = arith.constant dense<0.000000e+00> : vector<128xf32>
      %94 = vector.multi_reduction <add>, %93, %cst_36 [1] : vector<128x128xf32> to vector<128xf32>
      %95 = vector.shape_cast %94 : vector<128xf32> to vector<128x1xf32>
      %cst_37 = arith.constant 1.000000e-24 : f32
      %96 = vector.broadcast %cst_37 : f32 to vector<128x1xf32>
      %97 = arith.maximumf %95, %96 : vector<128x1xf32>
      %98 = math.rsqrt %97 : vector<128x1xf32>
      %99 = vector.broadcast %98 : vector<128x1xf32> to vector<128x128xf32>
      %100 = arith.mulf %92, %99 : vector<128x128xf32>
      %101 = arith.truncf %100 : vector<128x128xf32> to vector<128x128xbf16>
      %c0_38 = arith.constant 0 : index
      %c0_39 = arith.constant 0 : index
      %102 = vector.load %arg6[%c0_38, %c0_39] : memref<128x128xbf16, #tpu.memory_space<vmem>>, vector<128x128xbf16>
      tpu.vector_store %arg6[%c0_38, %c0_39], %101 {strides = array<i32>} : memref<128x128xbf16, #tpu.memory_space<vmem>>, vector<128x128xbf16>,
    } else {
    }
    %c0 = arith.constant 0 : index
    %c0_1 = arith.constant 0 : index
    %3 = vector.load %arg1[%c0, %c0_1] : memref<128x128xf32, #tpu.memory_space<vmem>>, vector<128x128xf32>
    %4 = arith.mulf %3, %3 : vector<128x128xf32>
    %cst = arith.constant dense<0.000000e+00> : vector<128xf32>
    %5 = vector.multi_reduction <add>, %4, %cst [1] : vector<128x128xf32> to vector<128xf32>
    %6 = vector.shape_cast %5 : vector<128xf32> to vector<128x1xf32>
    %cst_2 = arith.constant 1.000000e-24 : f32
    %7 = vector.broadcast %cst_2 : f32 to vector<128x1xf32>
    %8 = arith.maximumf %6, %7 : vector<128x1xf32>
    %9 = math.rsqrt %8 : vector<128x1xf32>
    %10 = vector.broadcast %9 : vector<128x1xf32> to vector<128x128xf32>
    %11 = arith.mulf %3, %10 : vector<128x128xf32>
    %12 = arith.truncf %11 : vector<128x128xf32> to vector<128x128xbf16>
    %c0_3 = arith.constant 0 : index
    %c0_4 = arith.constant 0 : index
    %13 = vector.load %arg6[%c0_3, %c0_4] : memref<128x128xbf16, #tpu.memory_space<vmem>>, vector<128x128xbf16>
    %cst_5 = arith.constant dense<0.000000e+00> : vector<128x128xf32>
    %14 = tpu.matmul %12, %13, %cst_5 {dimension_numbers = #tpu.dot_dimension_numbers<[1], [1], [0], [0], [0, 0, 1, 0], [], []>} : vector<128x128xbf16>, vector<128x128xbf16>, vector<128x128xf32> -> vector<128x128xf32>
    %15 = tpu.iota {dimensions = array<i32: 1>} : vector<1x128xi32>
    %c8_i32 = arith.constant 8 : i32
    %16 = vector.broadcast %c8_i32 : i32 to vector<1x128xi32>
    %17 = arith.cmpi slt, %15, %16 : vector<1x128xi32>
    %cst_6 = arith.constant 1.000000e+00 : f32
    %18 = vector.broadcast %cst_6 : f32 to vector<128x128xf32>
    %19 = arith.mulf %14, %18 : vector<128x128xf32>
    %cst_7 = arith.constant -1.000000e+30 : f32
    %20 = vector.shape_cast %17 : vector<1x128xi1> to vector<1x128xi1>
    %21 = vector.broadcast %20 : vector<1x128xi1> to vector<128x128xi1>
    %22 = vector.broadcast %cst_7 : f32 to vector<128x128xf32>
    %23 = arith.select %21, %19, %22 : vector<128x128xi1>, vector<128x128xf32>
    %cst_8 = arith.constant dense<0xFF800000> : vector<128xf32>
    %24 = vector.multi_reduction <maximumf>, %23, %cst_8 [1] : vector<128x128xf32> to vector<128xf32>
    %25 = vector.shape_cast %24 : vector<128xf32> to vector<128x1xf32>
    %26 = vector.broadcast %25 : vector<128x1xf32> to vector<128x128xf32>
    %27 = arith.subf %23, %26 : vector<128x128xf32>
    %28 = math.exp %27 : vector<128x128xf32>
    %cst_9 = arith.constant dense<0.000000e+00> : vector<128xf32>
    %29 = vector.multi_reduction <add>, %28, %cst_9 [1] : vector<128x128xf32> to vector<128xf32>
    %30 = vector.shape_cast %29 : vector<128xf32> to vector<128x1xf32>
    %31 = tpu.reciprocal %30 {approx = true} : vector<128x1xf32> -> vector<128x1xf32>
    %32 = vector.broadcast %31 : vector<128x1xf32> to vector<128x128xf32>
    %33 = arith.mulf %28, %32 : vector<128x128xf32>
    %34 = vector.broadcast %25 : vector<128x1xf32> to vector<128x128xf32>
    %35 = arith.subf %23, %34 : vector<128x128xf32>
    %36 = math.log %30 : vector<128x1xf32>
    %37 = vector.broadcast %36 : vector<128x1xf32> to vector<128x128xf32>
    %38 = arith.subf %35, %37 : vector<128x128xf32>
    %c0_10 = arith.constant 0 : index
    %c0_11 = arith.constant 0 : index
    %39 = vector.load %arg3[%c0_10, %c0_11] : memref<128x1xi32, #tpu.memory_space<vmem>>, vector<128x1xi32>
    %c0_12 = arith.constant 0 : index
    %c0_13 = arith.constant 0 : index
    %40 = vector.load %arg4[%c0_12, %c0_13] : memref<1x128xi32, #tpu.memory_space<vmem>>, vector<1x128xi32>
    %41 = vector.broadcast %39 : vector<128x1xi32> to vector<128x128xi32>
    %42 = vector.broadcast %40 : vector<1x128xi32> to vector<128x128xi32>
    %43 = arith.cmpi eq, %41, %42 : vector<128x128xi32>
    %44 = vector.broadcast %17 : vector<1x128xi1> to vector<128x128xi1>
    %45 = arith.andi %43, %44 : vector<128x128xi1>
    %46 = arith.extui %45 : vector<128x128xi1> to vector<128x128xi32>
    %47 = arith.sitofp %46 : vector<128x128xi32> to vector<128x128xf32>
    %cst_14 = arith.constant dense<0.000000e+00> : vector<128xf32>
    %48 = vector.multi_reduction <add>, %47, %cst_14 [1] : vector<128x128xf32> to vector<128xf32>
    %49 = vector.shape_cast %48 : vector<128xf32> to vector<128x1xf32>
    %50 = tpu.reciprocal %49 {approx = true} : vector<128x1xf32> -> vector<128x1xf32>
    %cst_15 = arith.constant 8.000000e+00 : f32
    %51 = vector.broadcast %cst_15 : f32 to vector<128x1xf32>
    %52 = arith.subf %51, %49 : vector<128x1xf32>
    %53 = tpu.reciprocal %52 {approx = true} : vector<128x1xf32> -> vector<128x1xf32>
    %cst_16 = arith.constant 0.000000e+00 : f32
    %54 = vector.broadcast %cst_16 : f32 to vector<128x128xf32>
    %55 = arith.subf %54, %38 : vector<128x128xf32>
    %56 = vector.broadcast %50 : vector<128x1xf32> to vector<128x128xf32>
    %57 = arith.mulf %55, %56 : vector<128x128xf32>
    %cst_17 = arith.constant 1.000000e+00 : f32
    %58 = vector.broadcast %cst_17 : f32 to vector<128x128xf32>
    %59 = arith.subf %58, %33 : vector<128x128xf32>
    %cst_18 = arith.constant 1.000000e-10 : f32
    %60 = vector.broadcast %cst_18 : f32 to vector<128x128xf32>
    %61 = arith.addf %59, %60 : vector<128x128xf32>
    %62 = math.log %61 : vector<128x128xf32>
    %cst_19 = arith.constant 0.000000e+00 : f32
    %63 = vector.broadcast %cst_19 : f32 to vector<128x128xf32>
    %64 = arith.subf %63, %62 : vector<128x128xf32>
    %65 = vector.broadcast %53 : vector<128x1xf32> to vector<128x128xf32>
    %66 = arith.mulf %64, %65 : vector<128x128xf32>
    %cst_20 = arith.constant 0.000000e+00 : f32
    %67 = vector.shape_cast %17 : vector<1x128xi1> to vector<1x128xi1>
    %68 = vector.broadcast %67 : vector<1x128xi1> to vector<128x128xi1>
    %69 = vector.broadcast %cst_20 : f32 to vector<128x128xf32>
    %70 = arith.select %68, %66, %69 : vector<128x128xi1>, vector<128x128xf32>
    %71 = arith.select %45, %57, %70 : vector<128x128xi1>, vector<128x128xf32>
    %cst_21 = arith.constant dense<0.000000e+00> : vector<128xf32>
    %72 = vector.multi_reduction <add>, %71, %cst_21 [1] : vector<128x128xf32> to vector<128xf32>
    %73 = vector.shape_cast %72 : vector<128xf32> to vector<128x1xf32>
    %74 = tpu.iota {dimensions = array<i32: 0>} : vector<128x1xi32>
    %c128_i32 = arith.constant 128 : i32
    %75 = arith.muli %arg0, %c128_i32 : i32
    %76 = vector.broadcast %75 : i32 to vector<128x1xi32>
    %77 = arith.addi %74, %76 : vector<128x1xi32>
    %c8_i32_22 = arith.constant 8 : i32
    %78 = vector.broadcast %c8_i32_22 : i32 to vector<128x1xi32>
    %79 = arith.cmpi slt, %77, %78 : vector<128x1xi32>
    %cst_23 = arith.constant 0.000000e+00 : f32
    %80 = vector.broadcast %cst_23 : f32 to vector<128x1xf32>
    %81 = arith.select %79, %73, %80 : vector<128x1xi1>, vector<128x1xf32>
    %c0_24 = arith.constant 0 : index
    %c0_25 = arith.constant 0 : index
    %82 = vector.load %arg5[%c0_24, %c0_25] : memref<1x1xf32, #tpu.memory_space<vmem>>, vector<1x1xf32>
    %cst_26 = arith.constant dense<0.000000e+00> : vector<1xf32>
    %83 = vector.multi_reduction <add>, %81, %cst_26 [0] : vector<128x1xf32> to vector<1xf32>
    %84 = vector.shape_cast %83 : vector<1xf32> to vector<1x1xf32>
    %85 = arith.addf %82, %84 : vector<1x1xf32>
    %c0_27 = arith.constant 0 : index
    %c0_28 = arith.constant 0 : index
    %86 = vector.load %arg5[%c0_27, %c0_28] : memref<1x1xf32, #tpu.memory_space<vmem>>, vector<1x1xf32>
    tpu.vector_store %arg5[%c0_27, %c0_28], %85 {strides = array<i32>} : memref<1x1xf32, #tpu.memory_space<vmem>>, vector<1x1xf32>,
    %c0_i32_29 = arith.constant 0 : i32
    %87 = arith.cmpi eq, %arg0, %c0_i32_29 : i32
    %88 = arith.extui %87 : i1 to i32
    %c0_i32_30 = arith.constant 0 : i32
    %89 = arith.cmpi ne, %88, %c0_i32_30 : i32
    scf.if %89 {
      %c0_31 = arith.constant 0 : index
      %c0_32 = arith.constant 0 : index
      %90 = vector.load %arg5[%c0_31, %c0_32] : memref<1x1xf32, #tpu.memory_space<vmem>>, vector<1x1xf32>
      %cst_33 = arith.constant 1.250000e-01 : f32
      %91 = vector.broadcast %cst_33 : f32 to vector<1x1xf32>
      %92 = arith.mulf %90, %91 : vector<1x1xf32>
      %c0_34 = arith.constant 0 : index
      %c0_35 = arith.constant 0 : index
      %93 = vector.load %arg5[%c0_34, %c0_35] : memref<1x1xf32, #tpu.memory_space<vmem>>, vector<1x1xf32>
      tpu.vector_store %arg5[%c0_34, %c0_35], %92 {strides = array<i32>} : memref<1x1xf32, #tpu.memory_space<vmem>>, vector<1x1xf32>,
    } else {
    }
    return
  }
  func.func @transform_0(%arg0: i32) -> (i32, i32) {
    %c0_i32 = arith.constant 0 : i32
    %c0_i32_0 = arith.constant 0 : i32
    return %arg0, %c0_i32 : i32, i32
  }
  func.func @transform_1(%arg0: i32) -> (i32, i32) {
    %c0_i32 = arith.constant 0 : i32
    %c0_i32_0 = arith.constant 0 : i32
    %c0_i32_1 = arith.constant 0 : i32
    return %c0_i32, %c0_i32_0 : i32, i32
  }
  func.func @transform_2(%arg0: i32) -> (i32, i32) {
    %c0_i32 = arith.constant 0 : i32
    %c0_i32_0 = arith.constant 0 : i32
    return %arg0, %c0_i32 : i32, i32
  }
  func.func @transform_3(%arg0: i32) -> (i32, i32) {
    %c0_i32 = arith.constant 0 : i32
    %c0_i32_0 = arith.constant 0 : i32
    %c0_i32_1 = arith.constant 0 : i32
    return %c0_i32, %c0_i32_0 : i32, i32
  }
  func.func @transform_4(%arg0: i32) -> (i32, i32) {
    %c0_i32 = arith.constant 0 : i32
    %c0_i32_0 = arith.constant 0 : i32
    %c0_i32_1 = arith.constant 0 : i32
    return %c0_i32, %c0_i32_0 : i32, i32
  }
}

</mosaic_0001>

<bundles_post_ra>
// kernel: tpu_custom_call.1
= control target key start
LH: loop header
LB: loop body
LE: loop exit
PB: predicated region body
PF: predicated region fallthrough
CT: control target
= control target key end

     0   :  { %9 = vsyncpa [#allocation4], 0  ;;  %s1625_s0 = inlined_call_operand.vmem [shape: f32[128,128], index: 0, kind: input, shape index: {}]   ;;  %s1626_s1 = inlined_call_operand.hbm [shape: f32[128,128], index: 1, kind: input, shape index: {}]   ;;  %s1627_s2 = inlined_call_operand.vmem [shape: s32[128,1], index: 2, kind: input, shape index: {}]   ;;  %s1628_s3 = inlined_call_operand.vmem [shape: s32[1,128], index: 3, kind: input, shape index: {}]   ;;  %s1629_s4 = inlined_call_operand.hbm [shape: f32[1,1], index: 4, kind: output, shape index: {}]  }
   0x1   :  { %10 = vsyncpa [#allocation5], 0  ;;  %s1336_s15 = smov [#allocation3]   ;;  %s1288_s19 = scalar_lea.hbm %s1626_s1, 2048 }
   0x2   :  { %s18_s16 = sshll.u32 %s1336_s15, 4  ;;  %p1289_p0 = scmp.ne.s32.totalorder %s1626_s1, %s1288_s19  ;;  %s19_s16 = int_to_ptr.vmem [resolvable:$true] %s18_s16 }
   0x3   :  { %p1292_p1 = scmp.lt.u32.totalorder %s1288_s19, %s1626_s1 }
   0x5   :  { %p1294_p2 = pnand %p1292_p1, %p1289_p0 }
   0x7   :  { %1297 = shalt.err (!%p1294_p2)
}
   0x8   :  { %s1298_s24 = scalar_lea.vmem %s19_s16, 2048  ;;  %p1303_p4 = scmp.lt.s32.totalorder %s19_s16, %s19_s16 }
   0x9   :  { %p1299_p3 = scmp.ne.s32.totalorder %s19_s16, %s1298_s24  ;;  %p1304_p5 = scmp.lt.s32.totalorder %s1298_s24, %s1298_s24 }
   0xb   :  { %p1305_p6 = por %p1304_p5, %p1303_p4 }
   0xd   :  { %p1306_p7 = pnand %p1305_p6, %p1299_p3 }
   0xf   :  { %1309 = shalt.err (!%p1306_p7)
}
  0x10   :  { %s1337_s25 = smov 128   ;;  %s1338_s26 = smov 8  }
  0x11   :  { %24 = dma.hbm_to_vmem [thread:$0]  %s1626_s1, 2048, %s19_s16, [#allocation4], %s1337_s25, %s1337_s25, %s1338_s26  }
  0x12   :  { %1332 = dma.done.wait [#allocation4], 2048  }
  0x13   :  { %1333 = vsyncadd [#allocation4], 4294965248  ;;  %v1379_v0 = vld [vmem:[#allocation3] sm:$0xff]  ;;  %v1381_v1 = vld [vmem:[#allocation3 + $0x10] sm:$0xff]  ;;  %vm37_vm1 = vcmask 0  }
  0x14   :  { %v1383_v2 = vld [vmem:[#allocation3 + $0x8] sm:$0xff]  ;;  %v55_v3 = vmul.f32 %v1379_v0, %v1379_v0  ;;  %v57_v4 = vmul.f32 %v1381_v1, %v1381_v1  ;;  %v1389_v5 = vld [vmem:[#allocation3 + $0x18] sm:$0xff]  ;;  %v1397_v9 = vld [vmem:[#allocation3 + $0x20] sm:$0xff] }
  0x15   :  { %v56_v6 = vmul.f32 %v1383_v2, %v1383_v2  ;;  %v58_v7 = vmul.f32 %v1389_v5, %v1389_v5  ;;  %v1395_v8 = vld [vmem:[#allocation3 + $0x28] sm:$0xff]  ;;  %v59_v11 = vmul.f32 %v1397_v9, %v1397_v9  ;;  %v1403_v12 = vld [vmem:[#allocation3 + $0x38] sm:$0xff]  ;;  %v1405_v13 = vld [vmem:[#allocation3 + $0x30] sm:$0xff] }
  0x16   :  { %71 = vadd.xlane.f32.xlu0 %v55_v3  ;;  %75 = vadd.xlane.f32.xlu1 %v57_v4  ;;  %v60_v10 = vmul.f32 %v1395_v8, %v1395_v8  ;;  %v62_v14 = vmul.f32 %v1403_v12, %v1403_v12  ;;  %v61_v15 = vmul.f32 %v1405_v13, %v1405_v13  ;;  %v1411_v16 = vld [vmem:[#allocation3 + $0x48] sm:$0xff]  ;;  %v1413_v17 = vld [vmem:[#allocation3 + $0x40] sm:$0xff]  ;;  %v1419_v20 = vld [vmem:[#allocation3 + $0x58] sm:$0xff] }
  0x17   :  { %v64_v18 = vmul.f32 %v1411_v16, %v1411_v16  ;;  %v63_v19 = vmul.f32 %v1413_v17, %v1413_v17  ;;  %v1421_v21 = vld [vmem:[#allocation3 + $0x50] sm:$0xff]  ;;  %v66_v22 = vmul.f32 %v1419_v20, %v1419_v20  ;;  %v1427_v24 = vld [vmem:[#allocation3 + $0x68] sm:$0xff]  ;;  %v1429_v25 = vld [vmem:[#allocation3 + $0x60] sm:$0xff] }
  0x18   :  { %v65_v23 = vmul.f32 %v1421_v21, %v1421_v21  ;;  %v68_v26 = vmul.f32 %v1427_v24, %v1427_v24  ;;  %v67_v27 = vmul.f32 %v1429_v25, %v1429_v25  ;;  %v1435_v28 = vld [vmem:[#allocation3 + $0x78] sm:$0xff]  ;;  %v1437_v29 = vld [vmem:[#allocation3 + $0x70] sm:$0xff]  ;;  %v1446_v32 = vld [vmem:[%s1625_s0 + $0x8] sm:$0xff] }
  0x19   :  { %v70_v30 = vmul.f32 %v1435_v28, %v1435_v28  ;;  %v69_v31 = vmul.f32 %v1437_v29, %v1437_v29  ;;  %v1451_v33 = vld [vmem:[%s1625_s0] sm:$0xff]  ;;  %v184_v34 = vmul.f32 %v1446_v32, %v1446_v32  ;;  %v1460_v36 = vld [vmem:[%s1625_s0 + $0x18] sm:$0xff]  ;;  %v1465_v37 = vld [vmem:[%s1625_s0 + $0x10] sm:$0xff] }
  0x1a   :  { %73 = vadd.xlane.f32.xlu0 %v56_v6  ;;  %77 = vadd.xlane.f32.xlu1 %v58_v7  ;;  %v183_v35 = vmul.f32 %v1451_v33, %v1451_v33  ;;  %v186_v38 = vmul.f32 %v1460_v36, %v1460_v36  ;;  %v185_v39 = vmul.f32 %v1465_v37, %v1465_v37  ;;  %v1474_v40 = vld [vmem:[%s1625_s0 + $0x48] sm:$0xff]  ;;  %v1479_v41 = vld [vmem:[%s1625_s0 + $0x40] sm:$0xff]  ;;  %v1484_v42 = vld [vmem:[%s1625_s0 + $0x58] sm:$0xff] }
  0x1b   :  { %v192_v43 = vmul.f32 %v1474_v40, %v1474_v40  ;;  %v191_v44 = vmul.f32 %v1479_v41, %v1479_v41  ;;  %v1493_v45 = vld [vmem:[%s1625_s0 + $0x50] sm:$0xff]  ;;  %v194_v46 = vmul.f32 %v1484_v42, %v1484_v42  ;;  %v1502_v48 = vld [vmem:[%s1625_s0 + $0x28] sm:$0xff]  ;;  %v1507_v49 = vld [vmem:[%s1625_s0 + $0x20] sm:$0xff] }
  0x1c   :  { %v193_v47 = vmul.f32 %v1493_v45, %v1493_v45  ;;  %v188_v50 = vmul.f32 %v1502_v48, %v1502_v48  ;;  %v187_v51 = vmul.f32 %v1507_v49, %v1507_v49  ;;  %v1516_v52 = vld [vmem:[%s1625_s0 + $0x68] sm:$0xff]  ;;  %v1521_v53 = vld [vmem:[%s1625_s0 + $0x60] sm:$0xff]  ;;  %v1530_v56 = vld [vmem:[%s1625_s0 + $0x38] sm:$0xff] }
  0x1d   :  { %v196_v54 = vmul.f32 %v1516_v52, %v1516_v52  ;;  %v195_v55 = vmul.f32 %v1521_v53, %v1521_v53  ;;  %v1535_v57 = vld [vmem:[%s1625_s0 + $0x30] sm:$0xff]  ;;  %v190_v58 = vmul.f32 %v1530_v56, %v1530_v56  ;;  %v1544_v60 = vld [vmem:[%s1625_s0 + $0x78] sm:$0xff] }
  0x1e   :  { %81 = vadd.xlane.f32.xlu1 %v60_v10  ;;  %79 = vadd.xlane.f32.xlu0 %v59_v11  ;;  %v189_v59 = vmul.f32 %v1535_v57, %v1535_v57  ;;  %v1549_v61 = vld [vmem:[%s1625_s0 + $0x70] sm:$0xff]  ;;  %v198_v62 = vmul.f32 %v1544_v60, %v1544_v60 }
  0x1f   :  { %v197_v63 = vmul.f32 %v1549_v61, %v1549_v61 }
  0x22   :  { %85 = vadd.xlane.f32.xlu1 %v62_v14  ;;  %83 = vadd.xlane.f32.xlu0 %v61_v15 }
  0x26   :  { %89 = vadd.xlane.f32.xlu1 %v64_v18  ;;  %87 = vadd.xlane.f32.xlu0 %v63_v19 }
  0x2a   :  { %93 = vadd.xlane.f32.xlu1 %v66_v22  ;;  %91 = vadd.xlane.f32.xlu0 %v65_v23 }
  0x2e   :  { %97 = vadd.xlane.f32.xlu1 %v68_v26  ;;  %95 = vadd.xlane.f32.xlu0 %v67_v27 }
  0x32   :  { %101 = vadd.xlane.f32.xlu1 %v70_v30  ;;  %99 = vadd.xlane.f32.xlu0 %v69_v31 }
  0x36   :  { %201 = vadd.xlane.f32.xlu1 %v184_v34  ;;  %199 = vadd.xlane.f32.xlu0 %v183_v35 }
  0x3a   :  { %205 = vadd.xlane.f32.xlu1 %v186_v38  ;;  %203 = vadd.xlane.f32.xlu0 %v185_v39 }
  0x3e   :  { %217 = vadd.xlane.f32.xlu1 %v192_v43  ;;  %215 = vadd.xlane.f32.xlu0 %v191_v44 }
  0x42   :  { %221 = vadd.xlane.f32.xlu1 %v194_v46  ;;  %219 = vadd.xlane.f32.xlu0 %v193_v47 }
  0x46   :  { %209 = vadd.xlane.f32.xlu1 %v188_v50  ;;  %207 = vadd.xlane.f32.xlu0 %v187_v51 }
  0x4a   :  { %225 = vadd.xlane.f32.xlu1 %v196_v54  ;;  %223 = vadd.xlane.f32.xlu0 %v195_v55 }
  0x4e   :  { %213 = vadd.xlane.f32.xlu1 %v190_v58  ;;  %211 = vadd.xlane.f32.xlu0 %v189_v59 }
  0x52   :  { %229 = vadd.xlane.f32.xlu1 %v198_v62  ;;  %227 = vadd.xlane.f32.xlu0 %v197_v63 }
  0xa3   :  { %v72_v3 = vpop.xlane.xlu0 %71  ;;  %v76_v4 = vpop.xlane.xlu1 %75 }
  0xa4   :  { %v103_v6 = vmax.f32 %v72_v3, 1e-24  ;;  %v105_v7 = vmax.f32 %v76_v4, 1e-24 }
  0xa6   :  { %1212 = vrsqrt.f32 %v105_v7 }
  0xa7   :  { %v74_v10 = vpop.xlane.xlu0 %73  ;;  %v78_v11 = vpop.xlane.xlu1 %77  ;;  %1214 = vrsqrt.f32 %v103_v6 }
  0xa8   :  { %v104_v14 = vmax.f32 %v74_v10, 1e-24  ;;  %v106_v15 = vmax.f32 %v78_v11, 1e-24 }
  0xaa   :  { %1216 = vrsqrt.f32 %v104_v14 }
  0xab   :  { %1218 = vrsqrt.f32 %v106_v15  ;;  %v82_v18 = vpop.xlane.xlu1 %81  ;;  %v80_v19 = vpop.xlane.xlu0 %79 }
  0xac   :  { %v108_v22 = vmax.f32 %v82_v18, 1e-24  ;;  %v107_v23 = vmax.f32 %v80_v19, 1e-24 }
  0xae   :  { %1220 = vrsqrt.f32 %v108_v22 }
  0xaf   :  { %1222 = vrsqrt.f32 %v107_v23  ;;  %v86_v26 = vpop.xlane.xlu1 %85  ;;  %v84_v27 = vpop.xlane.xlu0 %83 }
  0xb0   :  { %v1213_v30 = vpop.eup %1212  ;;  %v110_v31 = vmax.f32 %v86_v26, 1e-24  ;;  %v109_v35 = vmax.f32 %v84_v27, 1e-24 }
  0xb1   :  { %v1215_v34 = vpop.eup %1214  ;;  %v137_v44 = vmul.f32 %v1213_v30, %v1381_v1 }
  0xb2   :  { %v135_v47 = vmul.f32 %v1215_v34, %v1379_v0  ;;  %1224 = vrsqrt.f32 %v110_v31 }
  0xb3   :  { %v90_v38 = vpop.xlane.xlu1 %89  ;;  %v88_v39 = vpop.xlane.xlu0 %87  ;;  %1226 = vrsqrt.f32 %v109_v35 }
  0xb4   :  { %v1217_v43 = vpop.eup %1216  ;;  %v112_v3 = vmax.f32 %v90_v38, 1e-24  ;;  %v111_v1 = vmax.f32 %v88_v39, 1e-24 }
  0xb5   :  { %v1219_v46 = vpop.eup %1218  ;;  %v136_v50 = vmul.f32 %v1217_v43, %v1383_v2 }
  0xb6   :  { %v138_v51 = vmul.f32 %v1219_v46, %v1389_v5  ;;  %1228 = vrsqrt.f32 %v112_v3 }
  0xb7   :  { %v151_v54 = vpack.c.bf16 %v136_v50, %v135_v47  ;;  %v94_v55 = vpop.xlane.xlu1 %93  ;;  %v92_v58 = vpop.xlane.xlu0 %91  ;;  %1230 = vrsqrt.f32 %v111_v1 }
  0xb8   :  { %v1221_v59 = vpop.eup %1220  ;;  %v152_v62 = vpack.c.bf16 %v138_v51, %v137_v44  ;;  %v114_v15 = vmax.f32 %v94_v55, 1e-24  ;;  %v113_v18 = vmax.f32 %v92_v58, 1e-24 }
  0xb9   :  { %v1223_v63 = vpop.eup %1222  ;;  %1156 = vmatprep.subr.bf16.mxu0 %v151_v54  ;;  %1188 = vmatprep.subr.bf16.mxu1 %v151_v54  ;;  %v140_v2 = vmul.f32 %v1221_v59, %v1395_v8 }
  0xba   :  { %1157 = vmatpush3.bf16.xpose.msra.mxu0 %v151_v54  ;;  %1196 = vmatpush3.bf16.xpose.msra.mxu1 %v151_v54  ;;  %v139_v0 = vmul.f32 %v1223_v63, %v1397_v9  ;;  %1232 = vrsqrt.f32 %v114_v15  ;;  %v1339_v15 = vmov 0  }
  0xbb   :  { %1158 = vmatprep.subr.bf16.mxu0 %v152_v62  ;;  %1189 = vmatprep.subr.bf16.mxu1 %v152_v62  ;;  %v98_v5 = vpop.xlane.xlu1 %97  ;;  %v96_v4 = vpop.xlane.xlu0 %95  ;;  %1234 = vrsqrt.f32 %v113_v18 }
  0xbc   :  { %v1225_v6 = vpop.eup %1224  ;;  %v153_v7 = vpack.c.bf16 %v140_v2, %v139_v0  ;;  %v116_v34 = vmax.f32 %v98_v5, 1e-24  ;;  %v115_v35 = vmax.f32 %v96_v4, 1e-24  ;;  %1210 = vset.pattern.permute.xlu1 %v1339_v15  ;;  %1211 = vset.pattern.permute.xlu0 %v1339_v15 }
  0xbd   :  { %v1227_v14 = vpop.eup %1226  ;;  %v142_v9 = vmul.f32 %v1225_v6, %v1403_v12 }
  0xbe   :  { %v141_v19 = vmul.f32 %v1227_v14, %v1405_v13 }
  0xbf   :  { %v102_v10 = vpop.xlane.xlu1 %101  ;;  %v100_v11 = vpop.xlane.xlu0 %99 }
  0xc0   :  { %v1229_v27 = vpop.eup %1228  ;;  %v154_v30 = vpack.c.bf16 %v142_v9, %v141_v19  ;;  %v118_v47 = vmax.f32 %v102_v10, 1e-24  ;;  %v117_v51 = vmax.f32 %v100_v11, 1e-24 }
  0xc1   :  { %v1231_v31 = vpop.eup %1230  ;;  %v144_v12 = vmul.f32 %v1229_v27, %v1411_v16 }
  0xc2   :  { %1159 = vmatpush3.bf16.xpose.msra.mxu0 %v152_v62  ;;  %1197 = vmatpush3.bf16.xpose.msra.mxu1 %v152_v62  ;;  %v143_v13 = vmul.f32 %v1231_v31, %v1413_v17 }
  0xc3   :  { %1160 = vmatprep.subr.bf16.mxu0 %v153_v7  ;;  %1190 = vmatprep.subr.bf16.mxu1 %v153_v7  ;;  %v202_v8 = vpop.xlane.xlu1 %201  ;;  %v200_v22 = vpop.xlane.xlu0 %199 }
  0xc4   :  { %v232_v23 = vmax.f32 %v202_v8, 1e-24  ;;  %v231_v26 = vmax.f32 %v200_v22, 1e-24  ;;  %v1233_v38 = vpop.eup %1232  ;;  %v155_v43 = vpack.c.bf16 %v144_v12, %v143_v13 }
  0xc5   :  { %v1235_v39 = vpop.eup %1234  ;;  %v146_v16 = vmul.f32 %v1233_v38, %v1419_v20 }
  0xc6   :  { %1236 = vrsqrt.f32 %v232_v23  ;;  %v145_v17 = vmul.f32 %v1235_v39, %v1421_v21 }
  0xc7   :  { %1238 = vrsqrt.f32 %v231_v26  ;;  %v206_v63 = vpop.xlane.xlu1 %205  ;;  %v204_v3 = vpop.xlane.xlu0 %203 }
  0xc8   :  { %1240 = vrsqrt.f32 %v116_v34  ;;  %v156_v59 = vpack.c.bf16 %v146_v16, %v145_v17  ;;  %v234_v1 = vmax.f32 %v206_v63, 1e-24  ;;  %v233_v2 = vmax.f32 %v204_v3, 1e-24 }
  0xc9   :  { %1242 = vrsqrt.f32 %v115_v35 }
  0xca   :  { %1161 = vmatpush3.bf16.xpose.msra.mxu0 %v153_v7  ;;  %1198 = vmatpush3.bf16.xpose.msra.mxu1 %v153_v7  ;;  %1244 = vrsqrt.f32 %v118_v47 }
  0xcb   :  { %1162 = vmatprep.subr.bf16.mxu0 %v154_v30  ;;  %1191 = vmatprep.subr.bf16.mxu1 %v154_v30  ;;  %1246 = vrsqrt.f32 %v117_v51  ;;  %v216_v14 = vpop.xlane.xlu0 %215 }
  0xcc   :  { %1248 = vrsqrt.f32 %v234_v1  ;;  %v239_v19 = vmax.f32 %v216_v14, 1e-24 }
  0xcd   :  { %1250 = vrsqrt.f32 %v233_v2 }
  0xd0   :  { %v1237_v44 = vpop.eup %1236 }
  0xd1   :  { %v1239_v46 = vpop.eup %1238  ;;  %v264_v50 = vmul.f32 %v1237_v44, %v1446_v32 }
  0xd2   :  { %1163 = vmatpush3.bf16.xpose.msra.mxu0 %v154_v30  ;;  %1199 = vmatpush3.bf16.xpose.msra.mxu1 %v154_v30  ;;  %v263_v54 = vmul.f32 %v1239_v46, %v1451_v33  ;;  %v1241_v58 = vpop.eup %1240  ;;  %v392_v46 = vlaneseq }
  0xd3   :  { %1164 = vmatprep.subr.bf16.mxu0 %v155_v43  ;;  %1192 = vmatprep.subr.bf16.mxu1 %v155_v43  ;;  %v1243_v62 = vpop.eup %1242  ;;  %v148_v33 = vmul.f32 %v1241_v58, %v1427_v24 }
  0xd4   :  { %v279_v55 = vpack.c.bf16 %v264_v50, %v263_v54  ;;  %v147_v32 = vmul.f32 %v1243_v62, %v1429_v25  ;;  %v1245_v21 = vpop.eup %1244  ;;  %v1582_v50 = vand.u32 127, %v392_v46 }
  0xd5   :  { %v1247_v0 = vpop.eup %1246  ;;  %v150_v4 = vmul.f32 %v1245_v21, %v1435_v28  ;;  %v605_v28 = vld [vmem:[%s1627_s2] sm:$0xff] }
  0xd6   :  { %1172 = vmatprep.mubr.bf16.mxu0 %v279_v55  ;;  %v157_v20 = vpack.c.bf16 %v148_v33, %v147_v32  ;;  %v149_v5 = vmul.f32 %v1247_v0, %v1437_v29  ;;  %v1249_v24 = vpop.eup %1248  ;;  %v218_v29 = vpop.xlane.xlu1 %217  ;;  %623 = vperm.xlu1 %1210, %v605_v28   ;;  %vm394_vm0 = vcmp.lt.s32.totalorder %v1582_v50, 8 }
  0xd7   :  { %v1251_v6 = vpop.eup %1250  ;;  %v266_v10 = vmul.f32 %v1249_v24, %v1460_v36  ;;  %v240_v18 = vmax.f32 %v218_v29, 1e-24  ;;  %v220_v36 = vpop.xlane.xlu0 %219 }
  0xd8   :  { %v158_v25 = vpack.c.bf16 %v150_v4, %v149_v5  ;;  %v265_v7 = vmul.f32 %v1251_v6, %v1465_v37  ;;  %v241_v8 = vmax.f32 %v220_v36, 1e-24 }
  0xd9   :  { %1252 = vrsqrt.f32 %v240_v18 }
  0xda   :  { %1165 = vmatpush3.bf16.xpose.msra.mxu0 %v155_v43  ;;  %1200 = vmatpush3.bf16.xpose.msra.mxu1 %v155_v43  ;;  %v280_v11 = vpack.c.bf16 %v266_v10, %v265_v7  ;;  %1254 = vrsqrt.f32 %v239_v19  ;;  %v222_v37 = vpop.xlane.xlu1 %221  ;;  %v1340_v19 = vmov 0.0  }
  0xdb   :  { %1166 = vmatprep.subr.bf16.mxu0 %v156_v59  ;;  %1193 = vmatprep.subr.bf16.mxu1 %v156_v59  ;;  %v242_v9 = vmax.f32 %v222_v37, 1e-24  ;;  %v208_v39 = vpop.xlane.xlu0 %207  ;;  %38 = vst.msk [vmem:[#allocation6] sm:$0x1] %vm37_vm1, %v1340_v19 }
  0xdc   :  { %v235_v51 = vmax.f32 %v208_v39, 1e-24 }
  0xdd   :  { %1256 = vrsqrt.f32 %v242_v9 }
  0xde   :  { %1258 = vrsqrt.f32 %v241_v8  ;;  %v210_v38 = vpop.xlane.xlu1 %209 }
  0xdf   :  { %v224_v44 = vpop.xlane.xlu0 %223 }
  0xe0   :  { %v243_v17 = vmax.f32 %v224_v44, 1e-24 }
  0xe2   :  { %1167 = vmatpush3.bf16.xpose.msra.mxu0 %v156_v59  ;;  %1201 = vmatpush3.bf16.xpose.msra.mxu1 %v156_v59  ;;  %v226_v43 = vpop.xlane.xlu1 %225 }
  0xe3   :  { %1168 = vmatprep.subr.bf16.mxu0 %v157_v20  ;;  %1194 = vmatprep.subr.bf16.mxu1 %v157_v20  ;;  %v1253_v22 = vpop.eup %1252  ;;  %v244_v54 = vmax.f32 %v226_v43, 1e-24 }
  0xe4   :  { %v1255_v23 = vpop.eup %1254  ;;  %v272_v26 = vmul.f32 %v1253_v22, %v1474_v40  ;;  %v212_v40 = vpop.xlane.xlu0 %211 }
  0xe5   :  { %v271_v27 = vmul.f32 %v1255_v23, %v1479_v41  ;;  %v236_v41 = vmax.f32 %v210_v38, 1e-24  ;;  %v237_v32 = vmax.f32 %v212_v40, 1e-24 }
  0xe6   :  { %v214_v47 = vpop.xlane.xlu1 %213 }
  0xe7   :  { %v1257_v30 = vpop.eup %1256  ;;  %v283_v31 = vpack.c.bf16 %v272_v26, %v271_v27  ;;  %1260 = vrsqrt.f32 %v236_v41  ;;  %v238_v55 = vmax.f32 %v214_v47, 1e-24 }
  0xe8   :  { %v1259_v34 = vpop.eup %1258  ;;  %v274_v35 = vmul.f32 %v1257_v30, %v1484_v42  ;;  %1262 = vrsqrt.f32 %v235_v51  ;;  %v228_v58 = vpop.xlane.xlu0 %227 }
  0xe9   :  { %1180 = vmatprep.mubr.bf16.mxu1 %v283_v31  ;;  %v273_v13 = vmul.f32 %v1259_v34, %v1493_v45  ;;  %1264 = vrsqrt.f32 %v244_v54  ;;  %v245_v3 = vmax.f32 %v228_v58, 1e-24 }
  0xea   :  { %1169 = vmatpush3.bf16.xpose.msra.mxu0 %v157_v20  ;;  %1202 = vmatpush3.bf16.xpose.msra.mxu1 %v157_v20  ;;  %v230_v45 = vpop.xlane.xlu1 %229  ;;  %1266 = vrsqrt.f32 %v243_v17 }
  0xeb   :  { %1170 = vmatprep.subr.bf16.mxu0 %v158_v25  ;;  %1195 = vmatprep.subr.bf16.mxu1 %v158_v25  ;;  %v284_v12 = vpack.c.bf16 %v274_v35, %v273_v13  ;;  %v246_v63 = vmax.f32 %v230_v45, 1e-24  ;;  %1268 = vrsqrt.f32 %v238_v55 }
  0xec   :  { %1270 = vrsqrt.f32 %v237_v32 }
  0xed   :  { %1272 = vrsqrt.f32 %v246_v63 }
  0xee   :  { %1274 = vrsqrt.f32 %v245_v3 }
  0xf1   :  { %v1261_v21 = vpop.eup %1260 }
  0xf2   :  { %1171 = vmatpush3.bf16.xpose.msra.mxu0 %v158_v25  ;;  %1203 = vmatpush3.bf16.xpose.msra.mxu1 %v158_v25  ;;  %v1263_v1 = vpop.eup %1262  ;;  %v268_v5 = vmul.f32 %v1261_v21, %v1502_v48 }
  0xf3   :  { %v1265_v20 = vpop.eup %1264  ;;  %v267_v2 = vmul.f32 %v1263_v1, %v1507_v49 }
  0xf4   :  { %v1267_v0 = vpop.eup %1266 }
  0xf5   :  { %v1269_v4 = vpop.eup %1268  ;;  %v281_v24 = vpack.c.bf16 %v268_v5, %v267_v2  ;;  %v275_v10 = vmul.f32 %v1267_v0, %v1521_v53  ;;  %v1077_v2 = vld [vmem:[#allocation6] sm:$0x1] }
  0xf6   :  { %v1271_v25 = vpop.eup %1270  ;;  %v270_v29 = vmul.f32 %v1269_v4, %v1530_v56 }
  0xf7   :  { %v1273_v6 = vpop.eup %1272  ;;  %v269_v28 = vmul.f32 %v1271_v25, %v1535_v57 }
  0xf8   :  { %v1275_v7 = vpop.eup %1274  ;;  %v278_v48 = vmul.f32 %v1273_v6, %v1544_v60  ;;  %v1123_v60 = vld [vmem:[%s1628_s3] ss:$0 sm:$0xff]  ;;  %s1341_s3 = smov [#allocation6]  }
  0xf9   :  { %1173 = vmatmul.mubr.bf16.vlgmr.msra.gmra.mrb[0].mxu0 %v280_v11  ;;  %1181 = vmatmul.mubr.bf16.vlgmr.msra.gmra.mrb[0].mxu1 %v284_v12  ;;  %v276_v11 = vmul.f32 %v1265_v20, %v1516_v52  ;;  %v282_v15 = vpack.c.bf16 %v270_v29, %v269_v28  ;;  %v277_v49 = vmul.f32 %v1275_v7, %v1549_v61  ;;  %s1114_s9 = sshll.u32 %s1341_s3, 4  ;;  %s1115_s9 = int_to_ptr.vmem [resolvable:$true] %s1114_s9 }
  0xfa   :  { %1176 = vmatprep.mubr.bf16.mxu0 %v281_v24  ;;  %s1310_s10 = scalar_lea.vmem %s1115_s9, 16  ;;  %s1314_s11 = scalar_lea.vmem %s1115_s9, 32 }
  0xfb   :  { %v285_v14 = vpack.c.bf16 %v276_v11, %v275_v10  ;;  %v286_v18 = vpack.c.bf16 %v278_v48, %v277_v49  ;;  %p1311_p8 = scmp.ne.s32.totalorder %s1115_s9, %s1310_s10  ;;  %p1315_p9 = scmp.lt.s32.totalorder %s1115_s9, %s1115_s9 }
  0xfc   :  { %p1316_p10 = scmp.lt.s32.totalorder %s1314_s11, %s1310_s10 }
  0xfd   :  { %1184 = vmatprep.mubr.bf16.mxu1 %v285_v14 }
  0xfe   :  { %p1317_p11 = por %p1316_p10, %p1315_p9 }
 0x100   :  { %p1318_p12 = pnand %p1317_p11, %p1311_p8 }
 0x101   :  { %1177 = vmatmul.mubr.bf16.gmra.mrb[4].mxu0 %v282_v15  ;;  %1185 = vmatmul.mubr.bf16.gmra.mrb[4].mxu1 %v286_v18 }
 0x155   :  { %v624_v61 = vpop.permute.xlu1 %623 }
 0x156   :  { %vm674_vm2 = vcmp.eq.s32.totalorder %v624_v61, %v1123_v60 }
 0x157   :  { %vm1601_vm3 = vmand %vm674_vm2, %vm394_vm0 }
 0x158   :  { %v1124_v23 = vsel %vm1601_vm3, 1.0, %v1340_v19 }
 0x1cc   :  { %v1174_v42 = vpop.f32.mrb[0].mxu0  ;;  %v1182_v53 = vpop.f32.mrb[0].mxu1 }
 0x1cd   :  { %v329_v16 = vpop.f32.mrb[1].mxu0  ;;  %v361_v52 = vpop.f32.mrb[1].mxu1 }
 0x1ce   :  { %v1175_v59 = vpop.f32.mrb[2].mxu0  ;;  %v397_v62 = vsel %vm394_vm0, %v329_v16, -1e+30  ;;  %v1183_v37 = vpop.f32.mrb[2].mxu1 }
 0x1cf   :  { %413 = vmax.xlane.f32.xlu0 %v397_v62  ;;  %v332_v33 = vpop.f32.mrb[3].mxu0  ;;  %v364_v57 = vpop.f32.mrb[3].mxu1 }
 0x1d4   :  { %v1178_v26 = vpop.f32.mrb[4].mxu0  ;;  %v1186_v31 = vpop.f32.mrb[4].mxu1 }
 0x1d5   :  { %v345_v27 = vpop.f32.mrb[5].mxu0  ;;  %v377_v35 = vpop.f32.mrb[5].mxu1 }
 0x1d6   :  { %v1179_v30 = vpop.f32.mrb[6].mxu0  ;;  %v1187_v13 = vpop.f32.mrb[6].mxu1 }
 0x1d7   :  { %v348_v34 = vpop.f32.mrb[7].mxu0  ;;  %v380_v12 = vpop.f32.mrb[7].mxu1 }
 0x25c   :  { %v414_v36 = vpop.xlane.xlu0 %413 }
 0x25d   :  { %v445_v56 = vsub.f32 %v397_v62, %v414_v36 }
 0x25f   :  { %v461_v9 = vmul.f32 1.442695, %v445_v56 }
 0x261   :  { %1276 = vpow2.f32 %v461_v9 }
 0x26b   :  { %v1277_v22 = vpop.eup %1276 }
 0x26c   :  { %493 = vadd.xlane.f32.xlu0 %v1277_v22 }
 0x270   :  { %738 = vadd.xlane.f32.xlu0 %v1124_v23 }
 0x2f9   :  { %v494_v38 = vpop.xlane.xlu0 %493 }
 0x2fa   :  { %1278 = vrcp.f32 %v494_v38 }
 0x2fb   :  { %1280 = vlog2.f32 %v494_v38 }
 0x2fd   :  { %v739_v46 = vpop.xlane.xlu0 %738 }
 0x2fe   :  { %v786_v47 = vsub.f32 8.0, %v739_v46 }
 0x304   :  { %v1279_v39 = vpop.eup %1278 }
 0x305   :  { %v541_v43 = vmul.f32 %v1279_v39, %v1277_v22  ;;  %v1281_v41 = vpop.eup %1280 }
 0x306   :  { %v558_v51 = vmul.f32 0.6931472, %v1281_v41 }
 0x307   :  { %v850_v44 = vsub.f32 1.0, %v541_v43 }
 0x308   :  { %v589_v54 = vsub.f32 %v445_v56, %v558_v51 }
 0x309   :  { %v866_v40 = vadd.f32 1e-10, %v850_v44 }
 0x30a   :  { %v818_v16 = vsub.f32 0.0, %v589_v54 }
 0x30b   :  { %1282 = vlog2.f32 %v866_v40 }
 0x30c   :  { %1284 = vrcp.f32 %v786_v47 }
 0x30d   :  { %1286 = vrcp.f32 %v739_v46 }
 0x315   :  { %v1283_v42 = vpop.eup %1282 }
 0x316   :  { %v883_v17 = vmul.f32 0.6931472, %v1283_v42  ;;  %v1285_v45 = vpop.eup %1284 }
 0x317   :  { %v1287_v55 = vpop.eup %1286 }
 0x318   :  { %v914_v58 = vsub.f32 0.0, %v883_v17  ;;  %v834_v62 = vmul.f32 %v1287_v55, %v818_v16 }
 0x31a   :  { %v930_v59 = vmul.f32 %v1285_v45, %v914_v58 }
 0x31c   :  { %v946_v32 = vsel %vm394_vm0, %v930_v59, 0.0 }
 0x31d   :  { %v962_v33 = vsel %vm1601_vm3, %v834_v62, %v946_v32 }
 0x31e   :  { %978 = vadd.xlane.f32.xlu0 %v962_v33 }
 0x3ab   :  { %v979_v63 = vpop.xlane.xlu0 %978 }
 0x3ac   :  { %v1093_v3 = vrot.slane %v979_v63, 4 }
 0x3ae   :  { %v1094_v21 = vadd.f32 %v1093_v3, %v979_v63 }
 0x3b0   :  { %v1095_v1 = vrot.slane %v1094_v21, 2 }
 0x3b2   :  { %v1096_v20 = vadd.f32 %v1095_v1, %v1094_v21 }
 0x3b4   :  { %v1097_v0 = vrot.slane %v1096_v20, 1 }
 0x3b6   :  { %v1098_v5 = vadd.f32 %v1097_v0, %v1096_v20 }
 0x3b8   :  { %v1099_v4 = vadd.f32 %v1098_v5, %v1077_v2 }
 0x3ba   :  { %1101 = vst.msk [vmem:[#allocation6] sm:$0x1] %vm37_vm1, %v1099_v4 }
 0x3c1   :  { %v1105_v25 = vld [vmem:[#allocation6] sm:$0x1] }
 0x3c2   :  { %v1106_v50 = vmul.f32 0.125, %v1105_v25 }
 0x3c4   :  { %1107 = vst.msk [vmem:[#allocation6] sm:$0x1] %vm37_vm1, %v1106_v50 }
 0x3c5   :  { %1321 = shalt.err (!%p1318_p12)
}
 0x3c6   :  { %s1322_s14 = scalar_lea.hbm %s1629_s4, 16 }
 0x3c7   :  { %p1323_p13 = scmp.ne.s32.totalorder %s1629_s4, %s1322_s14  ;;  %p1326_p0 = scmp.lt.u32.totalorder %s1322_s14, %s1629_s4 }
 0x3c9   :  { %p1328_p1 = pnand %p1326_p0, %p1323_p13 }
 0x3cb   :  { %1331 = shalt.err (!%p1328_p1)
}
 0x3cc   :  { %1117 = dma.vmem_to_hbm [thread:$0]  %s1115_s9, 16, %s1629_s4, [#allocation5]  }
 0x3cd   :  { %1334 = dma.done.wait [#allocation5], 16  }
 0x3ce   :  { %1335 = vsyncadd [#allocation5], 4294967280 }
 0x3cf   :  { %1121 = vsyncpa [#allocation4], 1 }
 0x3d0   :  { %1122 = vsyncpa [#allocation5], 1 }

</bundles_post_ra>
